<compile_context>
chip_gen: v7x
topology: tpu7x:2x2x1
jax: 0.10.0
libtpu: 0.0.40
codegen_flags: <defaults>
</compile_context>

<pallas_src>
import math

import jax
import jax.numpy as jnp
from jax.experimental import pallas as pl
from jax.experimental.pallas import tpu as pltpu


def make_positional_encoding(seq_len: int, dim: int) -> jnp.ndarray:
    """Deterministic sinusoidal PE buffer, identical to the PyTorch __init__."""
    assert dim % 2 == 0, "sinusoidal PE requires an even feature dim"
    position = jnp.arange(seq_len, dtype=jnp.float32)[:, None]            # (S, 1)
    div_term = jnp.exp(
        jnp.arange(0, dim, 2, dtype=jnp.float32) * (-math.log(10000.0) / dim)
    )                                                                      # (D/2,)
    pe = jnp.zeros((seq_len, dim), dtype=jnp.float32)
    pe = pe.at[:, 0::2].set(jnp.sin(position * div_term))
    pe = pe.at[:, 1::2].set(jnp.cos(position * div_term))
    return pe[None, :, :]                                                  # (1, S, D)


def _add_pe_kernel(x_ref, pe_ref, o_ref):
    # Hot path: elementwise add. Batch broadcast is realized by the PE
    # BlockSpec selecting block 0 along the (squeezed) batch dim every step.
    o_ref[...] = x_ref[...] + pe_ref[...]


def _sublane(dtype) -> int:
    """Native sublane packing granularity: 8 f32, 16 bf16, 32 int8/fp8."""
    return max(8, 32 // jnp.dtype(dtype).itemsize)


def _vmem_capacity_bytes() -> int:
    try:
        return int(pltpu.get_tpu_info().vmem_capacity_bytes)
    except Exception:
        return 64 << 20  # conservative: v7x per-TensorCore VMEM


def _pick_row_tile(total_rows: int, row_bytes: int,
                   target_block_bytes: int, sub: int) -> int:
    """Largest row tile under the byte target, rounded to sublane granularity.
    No divisibility requirement: the grid uses cdiv + a partial trailing block."""
    max_rows = max(1, target_block_bytes // max(1, row_bytes))
    if total_rows <= max_rows:
        return total_rows
    return max(sub, (max_rows // sub) * sub)


def _ensure_min_grid_steps(total_rows: int, tile: int, batch: int,
                           sub: int, min_steps: int = 4) -> int:
    """Shrink the row tile (keeping sublane granularity) until the grid has at
    least `min_steps` steps, so v7x megacore sharding has work for both TCs."""
    while pl.cdiv(total_rows, tile) * batch < min_steps:
        cand = max(sub, ((tile // 2) // sub) * sub)
        if cand >= tile or cand >= total_rows:
            break
        tile = cand
    return tile


def positional_layer(x: jnp.ndarray, pe: jnp.ndarray,
                     *, target_block_bytes: int = 4 << 20) -> jnp.ndarray:
    """x: (B, S, D); pe: (1, max_seq_len, D) with max_seq_len >= S."""
    B, S, D = x.shape
    assert pe.ndim == 3 and pe.shape[0] == 1 and pe.shape[2] == D, "bad pe shape"
    assert pe.shape[1] >= S, "pe buffer shorter than input sequence length"

    # Static slice/cast; fuses / constant-folds when this wrapper is jitted
    # (or pre-slice + pre-cast the PE buffer once at init time).
    pe_sliced = pe[:, :S, :]
    if pe_sliced.dtype != x.dtype:
        # Note: matches "x + pe" result dtype; for bf16 x this adds in bf16.
        pe_sliced = pe_sliced.astype(x.dtype)

    itemsize = jnp.dtype(x.dtype).itemsize
    lane = 128
    sub = _sublane(x.dtype)

    # Flatten to a lane-dense view; pad the flattened length up to a multiple
    # of 128 if needed so output stores are always unmasked 128-wide vst.
    F = S * D
    Fp = pl.cdiv(F, lane) * lane
    xf = x.reshape(B, F)
    pef = pe_sliced.reshape(1, F)
    if Fp != F:
        xf = jnp.pad(xf, ((0, 0), (0, Fp - F)))
        pef = jnp.pad(pef, ((0, 0), (0, Fp - F)))
    R = Fp // lane
    xv = xf.reshape(B, R, lane)
    pev = pef.reshape(1, R, lane)

    # Per-generation block budget: ~6 double-buffered blocks live at once,
    # keep them under ~half of this chip's VMEM (v7x: 64 MiB; v5e/v6e: 128 MiB).
    vmem_cap = _vmem_capacity_bytes()
    tgt = min(target_block_bytes, max(256 << 10, vmem_cap // 12))
    tR = _pick_row_tile(R, lane * itemsize, tgt, sub)
    tR = _ensure_min_grid_steps(R, tR, B, sub)

    grid = (pl.cdiv(R, tR), B)  # batch innermost -> PE block stays resident

    block_bytes = tR * lane * itemsize
    vmem_limit = int(min(vmem_cap * 3 // 4, max(32 << 20, 8 * block_bytes)))

    data_spec = pl.BlockSpec((pl.Squeezed(), tR, lane), lambda r, b: (b, r, 0))
    pe_spec = pl.BlockSpec((pl.Squeezed(), tR, lane), lambda r, b: (0, r, 0))

    out = pl.pallas_call(
        _add_pe_kernel,
        out_shape=jax.ShapeDtypeStruct((B, R, lane), x.dtype),
        grid_spec=pltpu.PrefetchScalarGridSpec(
            num_scalar_prefetch=0,
            grid=grid,
            in_specs=[data_spec, pe_spec],
            out_specs=data_spec,
        ),
        compiler_params=pltpu.CompilerParams(
            dimension_semantics=("parallel", "parallel"),
            vmem_limit_bytes=vmem_limit,
        ),
        cost_estimate=pl.CostEstimate(
            flops=B * S * D,
            transcendentals=0,
            bytes_accessed=(2 * B + 1) * S * D * itemsize,
        ),
    )(xv, pev)

    out = out.reshape(B, Fp)
    if Fp != F:
        out = out[:, :F]
    return out.reshape(B, S, D)


if __name__ == "__main__":
    # Small shapes consistent with the module: batch=2, seq=8, dim=32, with a
    # PE buffer longer than the input sequence (exercises the :seq_len slice).
    batch, seq_len, dim = 2, 8, 32
    max_seq_len = 16

    key = jax.random.PRNGKey(0)
    x = jax.random.normal(key, (batch, seq_len, dim), dtype=jnp.float32)
    pe = make_positional_encoding(max_seq_len, dim)

    # Reference in plain JAX.
    ref = x + pe[:, :seq_len, :]

    # Jit the wrapper so the pe slice/cast constant-folds into the call.
    out = jax.jit(positional_layer)(x, pe)
    out = jax.block_until_ready(out)

    assert out.shape == (batch, seq_len, dim)
    assert jnp.allclose(out, ref, atol=1e-6), "mismatch vs reference"

    print("KERNEL_OK")
</pallas_src>

<mosaic_0001>
module attributes {stable_mosaic.version = 11 : i64} {
  func.func @_add_pe_kernel(%arg0: i32, %arg1: i32, %arg2: memref<1x2x128xf32, #tpu.memory_space<vmem>>, %arg3: memref<1x2x128xf32, #tpu.memory_space<vmem>>, %arg4: memref<1x2x128xf32, #tpu.memory_space<vmem>>) attributes {dimension_semantics = [#tpu.dimension_semantics<parallel>, #tpu.dimension_semantics<parallel>], iteration_bounds = array<i64: 1, 2>, scalar_prefetch = 0 : i64, scratch_operands = 0 : i64, tpu.core_type = #tpu.core_type<tc>, window_params = [{transform_indices = @transform_0, window_bounds = array<i64: 1, 2, 128>}, {transform_indices = @transform_1, window_bounds = array<i64: 1, 2, 128>}, {transform_indices = @transform_2, window_bounds = array<i64: 1, 2, 128>}]} {
    %c0 = arith.constant 0 : index
    %c0_0 = arith.constant 0 : index
    %c0_1 = arith.constant 0 : index
    %0 = vector.load %arg2[%c0, %c0_0, %c0_1] : memref<1x2x128xf32, #tpu.memory_space<vmem>>, vector<1x2x128xf32>
    %1 = vector.shape_cast %0 : vector<1x2x128xf32> to vector<2x128xf32>
    %c0_2 = arith.constant 0 : index
    %c0_3 = arith.constant 0 : index
    %c0_4 = arith.constant 0 : index
    %2 = vector.load %arg3[%c0_2, %c0_3, %c0_4] : memref<1x2x128xf32, #tpu.memory_space<vmem>>, vector<1x2x128xf32>
    %3 = vector.shape_cast %2 : vector<1x2x128xf32> to vector<2x128xf32>
    %4 = arith.addf %1, %3 : vector<2x128xf32>
    %c0_5 = arith.constant 0 : index
    %c0_6 = arith.constant 0 : index
    %c0_7 = arith.constant 0 : index
    %5 = vector.load %arg4[%c0_5, %c0_6, %c0_7] : memref<1x2x128xf32, #tpu.memory_space<vmem>>, vector<1x2x128xf32>
    %6 = vector.shape_cast %5 : vector<1x2x128xf32> to vector<2x128xf32>
    %7 = vector.shape_cast %4 : vector<2x128xf32> to vector<1x2x128xf32>
    tpu.vector_store %arg4[%c0_5, %c0_6, %c0_7], %7 {strides = array<i32>} : memref<1x2x128xf32, #tpu.memory_space<vmem>>, vector<1x2x128xf32>,
    return
  }
  func.func @transform_0(%arg0: i32, %arg1: i32) -> (i32, i32, i32) {
    %c0_i32 = arith.constant 0 : i32
    %c0_i32_0 = arith.constant 0 : i32
    return %arg1, %arg0, %c0_i32 : i32, i32, i32
  }
  func.func @transform_1(%arg0: i32, %arg1: i32) -> (i32, i32, i32) {
    %c0_i32 = arith.constant 0 : i32
    %c0_i32_0 = arith.constant 0 : i32
    %c0_i32_1 = arith.constant 0 : i32
    return %c0_i32, %arg0, %c0_i32_0 : i32, i32, i32
  }
  func.func @transform_2(%arg0: i32, %arg1: i32) -> (i32, i32, i32) {
    %c0_i32 = arith.constant 0 : i32
    %c0_i32_0 = arith.constant 0 : i32
    return %arg1, %arg0, %c0_i32 : i32, i32, i32
  }
}

</mosaic_0001>

<bundles_post_ra>
// kernel: positional_layer.1
= control target key start
LH: loop header
LB: loop body
LE: loop exit
PB: predicated region body
PF: predicated region fallthrough
CT: control target
= control target key end

     0   :  { %s354_s9 = smov 0   ;;  %s331_s10 = smov 0   ;;  %s368_s0 = inlined_call_operand.vmem [shape: f32[2,2,128], index: 0, kind: input, shape index: {}]   ;;  %s369_s1 = inlined_call_operand.vmem [shape: f32[1,2,128], index: 1, kind: input, shape index: {}]   ;;  %s370_s2 = inlined_call_operand.vmem [shape: f32[2,2,128], index: 2, kind: output, shape index: {}]  }
   0x1   :  { %s335_s11 = smov 0  }
   0x2 LB: > { %s21_s12 = sadd.s32 1, %s333_s10  ;;  %p286_p0 = scmp.ge.s32.totalorder %s337_s11, 1  ;;  %s337_s11 = sphi %s335_s11, %s12_s11   ;;  %s333_s10 = sphi %s331_s10, %s332_s10   ;;  %s329_s9 = sphi %s354_s9, %s371_s9  }
   0x3   : > { %p22_p1 = scmp.ge.s32.totalorder %s21_s12, 2  ;;  %p139_p2 = scmp.lt.s32.totalorder %s337_s11, 3 }
   0x5   : > { %s373_s12 = smov (%p22_p1, %s21_s12), 0  ;;  %p140_p3 = pnand %p286_p0, %p139_p2 }
   0x6   : > { %p169_p4 = scmp.lt.s32.totalorder (!%p140_p3), %s329_s9, 1  ;;  %v188_v0 = vld [vmem:[%s369_s1] sm:$0x3] (!%p140_p3) }
   0x7   : > { %143 = sbr.rel (%p140_p3) target bundleno = 21 (0x15), region = 28 }
   0xe   : > { %s375_s9 = smov (!%p169_p4, %s329_s9), 1 }
   0xf   : > { %s287_s13 = sshll.u32 %s375_s9, 1 }
  0x10   : > { %s175_s18 = scalar_lea.vmem %s368_s0, %s287_s13  ;;  %s186_s21 = scalar_lea.vmem %s370_s2, %s287_s13 }
  0x11   : > { %v187_v1 = vld [vmem:[%s175_s18] sm:$0x3] }
  0x12   : > { %v189_v2 = vadd.f32 %v188_v0, %v187_v1 }
  0x14   : > { %190 = vst [vmem:[%s186_s21] sm:$0x3] %v189_v2 }
  0x15 PF: > { %s12_s11 = sadd.s32 1, %s337_s11   ;;  %s371_s9 = smov %s333_s10 }
  0x16   : > { %p9_p5 = scmp.ge.s32.totalorder %s12_s11, 4   ;;  %s332_s10 = smov %s373_s12  }
  0x18   :  { %11 = sbr.rel (!%p9_p5) target bundleno = 2 (0x2), region = 61 }

</bundles_post_ra>
